<compile_context>
chip_gen: v6e
topology: v6e:2x2x1
jax: 0.10.0
libtpu: 0.0.40
codegen_flags: <defaults>
</compile_context>

<pallas_src>
from collections import namedtuple

import jax
import jax.numpy as jnp
from jax.experimental import pallas as pl
from jax.experimental.pallas import tpu as pltpu


def _inner_model_kernel(x_ref, w1t_ref, b1_ref, feat_ref, pool_ref):
    """One (image i, split s, spatial-tile j) step of conv1x1 + ReLU + pool-sum.

    Block shapes per grid step (i, s, j):
      x_ref:    (1, Cin,  TM)    bf16 input tile, channels-first (spatial on lanes)
      w1t_ref:  (Cout, Cin)      bf16 transposed 1x1-conv weight (untiled)
      b1_ref:   (Cout, 1)        f32 conv bias as a column (untiled)
      feat_ref: (1, Cout, TM)    bf16 feature tile (lane-dense, NCHW order)
      pool_ref: (1, 1, Cout, 1)  f32 per-(image, split) pooled-sum accumulator
                                 (revisited across j -> resident in VMEM)
    """
    j = pl.program_id(2)

    @pl.when(j == 0)
    def _init():
        pool_ref[...] = jnp.zeros_like(pool_ref)

    x = x_ref[0]                                             # (Cin, TM), bf16
    # MXU matmul in bf16, f32 accumulation; elementwise math stays f32.
    h = jnp.dot(w1t_ref[...], x,
                preferred_element_type=jnp.float32) + b1_ref[...]
    feats = jnp.maximum(h, 0.0)                              # f32 ReLU, (Cout, TM)
    feat_ref[0] = feats.astype(feat_ref.dtype)               # bf16 lane-dense store
    # Partial global-avg-pool: accumulate f32 spatial sums across tiles.
    pool_ref[0, 0] = pool_ref[0, 0] + jnp.sum(feats, axis=1, keepdims=True)


def _choose_spatial_tile(hw_padded, cin, cout, budget_bytes=16 * 1024 * 1024):
    """Largest lane-dense TM (multiple of 128, divides hw_padded) keeping the
    double-buffered bf16 x + bf16 feature tiles under `budget_bytes` (fits the
    scoped-VMEM default on all generations, incl. v7x's 64 MiB/TC)."""
    bytes_per_pos = 2 * 2 * (cin + cout)     # double-buffered bf16 x + bf16 feats
    best = 128
    tm = 128
    while tm <= hw_padded:
        if hw_padded % tm == 0 and tm * bytes_per_pos <= budget_bytes:
            best = tm
        tm += 128
    # Prefer >= 2 spatial tiles so the pipeline overlaps fetch/compute/writeback
    # and the v7x split axis has work to divide.
    if best == hw_padded and (hw_padded // 2) % 128 == 0:
        best = hw_padded // 2
    return best


def inner_model_forward(x_nchw, params):
    """Runs the inner model on an NCHW input; returns a dict (like a torch model)."""
    w1, b1, w2, b2 = params["w1"], params["b1"], params["w2"], params["b2"]
    n, cin, hgt, wid = x_nchw.shape
    cout = w1.shape[1]
    hw = hgt * wid
    hw_padded = ((hw + 127) // 128) * 128
    pad = hw_padded - hw

    # NCHW -> (N, Cin, H*W): contiguous reshape (no transpose); pad spatial
    # axis to a multiple of 128 so every tile is lane-dense.
    x_cl = x_nchw.reshape(n, cin, hw)
    if pad:
        x_cl = jnp.pad(x_cl, ((0, 0), (0, 0), (0, pad)))
    x_cl = x_cl.astype(jnp.bfloat16)                 # halve streamed HBM bytes
    w1t = jnp.transpose(w1).astype(jnp.bfloat16)     # (Cout, Cin), tiny one-off
    b1c = jnp.reshape(b1, (cout, 1)).astype(jnp.float32)

    tm = _choose_spatial_tile(hw_padded, cin, cout)
    tiles = hw_padded // tm
    n_splits = 2 if tiles % 2 == 0 else 1            # v7x: feed both TCs even at N=1
    tiles_per_split = tiles // n_splits
    grid = (n, n_splits, tiles_per_split)

    feats, pool_partials = pl.pallas_call(
        _inner_model_kernel,
        out_shape=(
            jax.ShapeDtypeStruct((n, cout, hw_padded), jnp.bfloat16),
            jax.ShapeDtypeStruct((n, n_splits, cout, 1), jnp.float32),
        ),
        grid=grid,
        in_specs=[
            pl.BlockSpec((1, cin, tm),
                         lambda i, s, j: (i, 0, s * tiles_per_split + j)),
            pl.BlockSpec((cout, cin), lambda i, s, j: (0, 0)),
            pl.BlockSpec((cout, 1), lambda i, s, j: (0, 0)),
        ],
        out_specs=(
            pl.BlockSpec((1, cout, tm),
                         lambda i, s, j: (i, 0, s * tiles_per_split + j)),
            pl.BlockSpec((1, 1, cout, 1), lambda i, s, j: (i, s, 0, 0)),
        ),
        compiler_params=pltpu.CompilerParams(
            dimension_semantics=("parallel", "parallel", "arbitrary"),
            vmem_limit_bytes=32 * 1024 * 1024,
        ),
        cost_estimate=pl.CostEstimate(
            flops=2 * n * hw_padded * cin * cout,
            transcendentals=0,
            bytes_accessed=(2 * n * (cin + cout) * hw_padded     # bf16 x + feats
                            + 2 * cout * cin                     # bf16 weight
                            + 4 * (cout + n * n_splits * cout)), # f32 bias + pool
        ),
    )(x_cl, w1t, b1c)

    # (N, Cout, H*W) is already NCHW order: slice off padding, free reshape.
    feats_nchw = feats[:, :, :hw].reshape(n, cout, hgt, wid)

    # Combine per-split pool partials; correct for zero-padded spatial
    # positions (each contributes exactly relu(0 @ w1 + b1) = relu(b1)).
    pool_total = jnp.sum(pool_partials, axis=1)[:, :, 0]        # (N, Cout), f32
    if pad:
        pool_total = pool_total - pad * jnp.maximum(jnp.reshape(b1, (-1,)), 0.0)
    pooled = pool_total * (1.0 / hw)                            # (N, Cout)

    # Tiny FC hoisted out of the hot loop: plain XLA on the pooled sums.
    logits = pooled @ w2 + b2                                   # (N, NCLS)
    return {"features": feats_nchw, "logits": logits}


def model_wrapper_forward(x_nchw, params):
    """JAX equivalent of ModelWrapper.forward."""
    data = inner_model_forward(x_nchw, params)
    if isinstance(data, dict):
        data_named_tuple = namedtuple("ModelEndpoints", sorted(data.keys()))
        data = data_named_tuple(**data)
    elif isinstance(data, list):
        data = tuple(data)
    return data


def init_params(key, cin, cout, ncls):
    k1, k2, k3, k4 = jax.random.split(key, 4)
    w1 = jax.random.normal(k1, (cin, cout), jnp.float32) * (1.0 / jnp.sqrt(cin))
    b1 = jax.random.normal(k2, (1, cout), jnp.float32) * 0.1
    w2 = jax.random.normal(k3, (cout, ncls), jnp.float32) * (1.0 / jnp.sqrt(cout))
    b2 = jax.random.normal(k4, (1, ncls), jnp.float32) * 0.1
    return {"w1": w1, "b1": b1, "w2": w2, "b2": b2}


def _reference(x_nchw, params):
    """Pure-jnp reference mirroring the kernel's numerics (bf16 inputs to the
    1x1 conv, f32 accumulation / elementwise / pooling / FC)."""
    n, cin, hgt, wid = x_nchw.shape
    xb = x_nchw.astype(jnp.bfloat16)
    w1b = params["w1"].astype(jnp.bfloat16)
    x2d = jnp.transpose(xb, (0, 2, 3, 1)).reshape(n * hgt * wid, cin)
    h = jnp.dot(x2d, w1b, preferred_element_type=jnp.float32) + params["b1"]
    feats = jnp.maximum(h, 0.0)                                 # f32
    feats_nchw = jnp.transpose(feats.reshape(n, hgt, wid, -1), (0, 3, 1, 2))
    pooled = feats.reshape(n, hgt * wid, -1).mean(axis=1)
    logits = pooled @ params["w2"] + params["b2"]
    return feats_nchw, logits


if __name__ == "__main__":
    N, CIN, H, W = 2, 4, 16, 16
    COUT, NCLS = 8, 10

    key = jax.random.PRNGKey(0)
    kx, kp = jax.random.split(key)
    x = jax.random.normal(kx, (N, CIN, H, W), jnp.float32)
    params = init_params(kp, CIN, COUT, NCLS)

    out = model_wrapper_forward(x, params)
    jax.block_until_ready(out)

    # Sorted dict keys -> namedtuple fields ("features", "logits").
    assert type(out).__name__ == "ModelEndpoints"
    assert out._fields == ("features", "logits")

    ref_feats, ref_logits = _reference(x, params)
    # Features are stored in bf16 by the kernel -> bf16-level tolerance.
    assert jnp.allclose(out.features.astype(jnp.float32), ref_feats,
                        atol=2e-2, rtol=2e-2)
    # Pool + FC stay in f32 -> tight tolerance.
    assert jnp.allclose(out.logits, ref_logits, atol=1e-2, rtol=1e-2)

    print("KERNEL_OK")
</pallas_src>

<mosaic_0001>
module attributes {stable_mosaic.version = 11 : i64} {
  func.func @_inner_model_kernel(%arg0: i32, %arg1: i32, %arg2: i32, %arg3: memref<1x4x128xbf16, #tpu.memory_space<vmem>>, %arg4: memref<8x4xbf16, #tpu.memory_space<vmem>>, %arg5: memref<8x1xf32, #tpu.memory_space<vmem>>, %arg6: memref<1x8x128xbf16, #tpu.memory_space<vmem>>, %arg7: memref<1x1x8x1xf32, #tpu.memory_space<vmem>>) attributes {dimension_semantics = [#tpu.dimension_semantics<parallel>, #tpu.dimension_semantics<parallel>, #tpu.dimension_semantics<arbitrary>], iteration_bounds = array<i64: 2, 2, 1>, scalar_prefetch = 0 : i64, scratch_operands = 0 : i64, tpu.core_type = #tpu.core_type<tc>, window_params = [{transform_indices = @transform_0, window_bounds = array<i64: 1, 4, 128>}, {pipeline_mode = #tpu.pipeline_mode<synchronous>, transform_indices = @transform_1, window_bounds = array<i64: 8, 4>}, {pipeline_mode = #tpu.pipeline_mode<synchronous>, transform_indices = @transform_2, window_bounds = array<i64: 8, 1>}, {transform_indices = @transform_3, window_bounds = array<i64: 1, 8, 128>}, {transform_indices = @transform_4, window_bounds = array<i64: 1, 1, 8, 1>}]} {
    %c0_i32 = arith.constant 0 : i32
    %0 = arith.cmpi eq, %arg2, %c0_i32 : i32
    %1 = arith.extui %0 : i1 to i32
    %c0_i32_0 = arith.constant 0 : i32
    %2 = arith.cmpi ne, %1, %c0_i32_0 : i32
    scf.if %2 {
      %cst_20 = arith.constant 0.000000e+00 : f32
      %24 = vector.broadcast %cst_20 : f32 to vector<1x1x8x1xf32>
      %c0_21 = arith.constant 0 : index
      %c0_22 = arith.constant 0 : index
      %c0_23 = arith.constant 0 : index
      %c0_24 = arith.constant 0 : index
      %25 = vector.load %arg7[%c0_21, %c0_22, %c0_23, %c0_24] : memref<1x1x8x1xf32, #tpu.memory_space<vmem>>, vector<1x1x8x1xf32>
      tpu.vector_store %arg7[%c0_21, %c0_22, %c0_23, %c0_24], %24 {strides = array<i32>} : memref<1x1x8x1xf32, #tpu.memory_space<vmem>>, vector<1x1x8x1xf32>,
    } else {
    }
    %c0 = arith.constant 0 : index
    %c0_1 = arith.constant 0 : index
    %c0_2 = arith.constant 0 : index
    %3 = vector.load %arg3[%c0, %c0_1, %c0_2] : memref<1x4x128xbf16, #tpu.memory_space<vmem>>, vector<1x4x128xbf16>
    %4 = vector.shape_cast %3 : vector<1x4x128xbf16> to vector<4x128xbf16>
    %c0_3 = arith.constant 0 : index
    %c0_4 = arith.constant 0 : index
    %5 = vector.load %arg4[%c0_3, %c0_4] : memref<8x4xbf16, #tpu.memory_space<vmem>>, vector<8x4xbf16>
    %cst = arith.constant dense<0.000000e+00> : vector<8x128xf32>
    %6 = tpu.matmul %5, %4, %cst {dimension_numbers = #tpu.dot_dimension_numbers<[1], [0], [0], [1], [0, 0, 1, 1], [], []>} : vector<8x4xbf16>, vector<4x128xbf16>, vector<8x128xf32> -> vector<8x128xf32>
    %c0_5 = arith.constant 0 : index
    %c0_6 = arith.constant 0 : index
    %7 = vector.load %arg5[%c0_5, %c0_6] : memref<8x1xf32, #tpu.memory_space<vmem>>, vector<8x1xf32>
    %8 = vector.broadcast %7 : vector<8x1xf32> to vector<8x128xf32>
    %9 = arith.addf %6, %8 : vector<8x128xf32>
    %cst_7 = arith.constant 0.000000e+00 : f32
    %10 = vector.broadcast %cst_7 : f32 to vector<8x128xf32>
    %11 = arith.maximumf %9, %10 : vector<8x128xf32>
    %12 = arith.truncf %11 : vector<8x128xf32> to vector<8x128xbf16>
    %c0_8 = arith.constant 0 : index
    %c0_9 = arith.constant 0 : index
    %c0_10 = arith.constant 0 : index
    %13 = vector.load %arg6[%c0_8, %c0_9, %c0_10] : memref<1x8x128xbf16, #tpu.memory_space<vmem>>, vector<1x8x128xbf16>
    %14 = vector.shape_cast %13 : vector<1x8x128xbf16> to vector<8x128xbf16>
    %15 = vector.shape_cast %12 : vector<8x128xbf16> to vector<1x8x128xbf16>
    tpu.vector_store %arg6[%c0_8, %c0_9, %c0_10], %15 {strides = array<i32>} : memref<1x8x128xbf16, #tpu.memory_space<vmem>>, vector<1x8x128xbf16>,
    %c0_11 = arith.constant 0 : index
    %c0_12 = arith.constant 0 : index
    %c0_13 = arith.constant 0 : index
    %c0_14 = arith.constant 0 : index
    %16 = vector.load %arg7[%c0_11, %c0_12, %c0_13, %c0_14] : memref<1x1x8x1xf32, #tpu.memory_space<vmem>>, vector<1x1x8x1xf32>
    %17 = vector.shape_cast %16 : vector<1x1x8x1xf32> to vector<8x1xf32>
    %cst_15 = arith.constant dense<0.000000e+00> : vector<8xf32>
    %18 = vector.multi_reduction <add>, %11, %cst_15 [1] : vector<8x128xf32> to vector<8xf32>
    %19 = vector.shape_cast %18 : vector<8xf32> to vector<8x1xf32>
    %20 = arith.addf %17, %19 : vector<8x1xf32>
    %c0_16 = arith.constant 0 : index
    %c0_17 = arith.constant 0 : index
    %c0_18 = arith.constant 0 : index
    %c0_19 = arith.constant 0 : index
    %21 = vector.load %arg7[%c0_16, %c0_17, %c0_18, %c0_19] : memref<1x1x8x1xf32, #tpu.memory_space<vmem>>, vector<1x1x8x1xf32>
    %22 = vector.shape_cast %21 : vector<1x1x8x1xf32> to vector<8x1xf32>
    %23 = vector.shape_cast %20 : vector<8x1xf32> to vector<1x1x8x1xf32>
    tpu.vector_store %arg7[%c0_16, %c0_17, %c0_18, %c0_19], %23 {strides = array<i32>} : memref<1x1x8x1xf32, #tpu.memory_space<vmem>>, vector<1x1x8x1xf32>,
    return
  }
  func.func @transform_0(%arg0: i32, %arg1: i32, %arg2: i32) -> (i32, i32, i32) {
    %c1_i32 = arith.constant 1 : i32
    %0 = arith.muli %arg1, %c1_i32 : i32
    %1 = arith.addi %0, %arg2 : i32
    %c0_i32 = arith.constant 0 : i32
    %c0_i32_0 = arith.constant 0 : i32
    return %arg0, %c0_i32, %1 : i32, i32, i32
  }
  func.func @transform_1(%arg0: i32, %arg1: i32, %arg2: i32) -> (i32, i32) {
    %c0_i32 = arith.constant 0 : i32
    %c0_i32_0 = arith.constant 0 : i32
    %c0_i32_1 = arith.constant 0 : i32
    return %c0_i32, %c0_i32_0 : i32, i32
  }
  func.func @transform_2(%arg0: i32, %arg1: i32, %arg2: i32) -> (i32, i32) {
    %c0_i32 = arith.constant 0 : i32
    %c0_i32_0 = arith.constant 0 : i32
    %c0_i32_1 = arith.constant 0 : i32
    return %c0_i32, %c0_i32_0 : i32, i32
  }
  func.func @transform_3(%arg0: i32, %arg1: i32, %arg2: i32) -> (i32, i32, i32) {
    %c1_i32 = arith.constant 1 : i32
    %0 = arith.muli %arg1, %c1_i32 : i32
    %1 = arith.addi %0, %arg2 : i32
    %c0_i32 = arith.constant 0 : i32
    %c0_i32_0 = arith.constant 0 : i32
    return %arg0, %c0_i32, %1 : i32, i32, i32
  }
  func.func @transform_4(%arg0: i32, %arg1: i32, %arg2: i32) -> (i32, i32, i32, i32) {
    %c0_i32 = arith.constant 0 : i32
    %c0_i32_0 = arith.constant 0 : i32
    %c0_i32_1 = arith.constant 0 : i32
    return %arg0, %arg1, %c0_i32, %c0_i32_0 : i32, i32, i32, i32
  }
}

</mosaic_0001>

<bundles_post_ra>
// kernel: tpu_custom_call.1
= control target key start
LH: loop header
LB: loop body
LE: loop exit
PB: predicated region body
PF: predicated region fallthrough
CT: control target
= control target key end

     0   :  { %s839_s0 = inlined_call_operand.vmem [shape: bf16[2,4,256], index: 0, kind: input, shape index: {}]   ;;  %s840_s1 = inlined_call_operand.vmem [shape: bf16[8,4], index: 1, kind: input, shape index: {}]   ;;  %s841_s2 = inlined_call_operand.vmem [shape: f32[8,1], index: 2, kind: input, shape index: {}]   ;;  %s842_s3 = inlined_call_operand.hbm [shape: bf16[2,8,256], index: 3, kind: output, shape index: {0}]   ;;  %s843_s4 = inlined_call_operand.vmem [shape: f32[2,2,8,1], index: 4, kind: output, shape index: {1}]  }
   0x1   :  { %844 = sst [smem:[#allocation5_spill]] %s839_s0 }
   0x2   :  { %845 = sst [smem:[#allocation6_spill]] %s840_s1 }
   0x3   :  { %10 = vsyncpa [#allocation3], 0 }
   0x4   :  { %12 = vsyncpa [#allocation3 + $0x1], 0  ;;  %s699_s15 = smov 0   ;;  %s701_s16 = smov 0  }
   0x5   :  { %s703_s17 = smov 0   ;;  %s705_s18 = smov 0  }
   0x6   :  { %s707_s19 = smov 0   ;;  %s709_s20 = smov 0  }
   0x7   :  { %s711_s21 = smov 0   ;;  %s713_s22 = smov 0  }
   0x8 LB: > { %s477_s23 = sadd.s32 4294967295, %s668_s22   ;;  %s478_s24 = sadd.s32 4294967294, %s668_s22   ;;  %s668_s22 = sphi %s713_s22, %s18_s22   ;;  %s664_s21 = sphi %s711_s21, %s856_s21   ;;  %s660_s20 = sphi %s709_s20, %s855_s20   ;;  %s656_s19 = sphi %s707_s19, %s854_s19   ;;  %s652_s18 = sphi %s705_s18, %s853_s18   ;;  %s648_s17 = sphi %s703_s17, %s852_s17   ;;  %s644_s16 = sphi %s701_s16, %s851_s16   ;;  %s640_s15 = sphi %s699_s15, %s850_s15  }
   0x9   : > { %s33_s25 = sadd.s32 1, %s660_s20  ;;  %s37_s26 = sadd.s32 1, %s664_s21 }
   0xa   : > { %p35_p0 = scmp.ge.s32.totalorder %s33_s25, 2  ;;  %p130_p1 = scmp.ne.s32.totalorder %s648_s17, %s644_s16 }
   0xb   : > { %p131_p2 = scmp.eq.s32.totalorder %s477_s23, 3  ;;  %p136_p5 = scmp.ne.s32.totalorder %s644_s16, %s640_s15 }
   0xc   : > { %s858_s25 = smov (%p35_p0, %s33_s25), 0  ;;  %s860_s26 = smov (!%p35_p0, %s37_s26), %s664_s21 }
   0xd   : > { %s116_s27 = ssub.s32 %s660_s20, %s858_s25  ;;  %p750_p3 = por %p131_p2, %p130_p1 }
   0xe   : > { %p39_p4 = scmp.ge.s32.totalorder %s860_s26, 2  ;;  %p137_p6 = scmp.eq.s32.totalorder %s478_s24, 3 }
   0xf   : > { %p481_p7 = scmp.ge.s32.totalorder %s668_s22, 1  ;;  %p202_p9 = scmp.lt.s32.totalorder %s668_s22, 5 }
  0x10   : > { %s862_s26 = smov (%p39_p4, %s860_s26), 0  ;;  %p759_p8 = por %p137_p6, %p136_p5 }
  0x11   : > { %s115_s30 = ssub.s32 %s664_s21, %s862_s26  ;;  %s120_s5 = sadd.s32 1, %s648_s17 }
  0x12   : > { %s117_s6 = sor.u32 %s116_s27, %s115_s30  ;;  %p203_p10 = pnand %p481_p7, %p202_p9 }
  0x13   : > { %p118_p11 = scmp.eq.s32.totalorder %s117_s6, 0  ;;  %p241_p12 = scmp.lt.s32.totalorder (!%p203_p10), %s656_s19, 1 }
  0x14   : > { %206 = sbr.rel (%p203_p10) target bundleno = 374 (0x176), region = 32  ;;  %p243_p13 = scmp.lt.s32.totalorder (!%p203_p10), %s652_s18, 1 }
  0x15   : > { %s768_s7 = scalar_select %p118_p11, %s648_s17, %s120_s5  }
  0x16   : > { %s848_s0 = sld [smem:[#allocation5_spill]] (!%p203_p10) }
  0x17   : > { %s849_s1 = sld [smem:[#allocation6_spill]] (!%p203_p10) }
  0x19   : > { %v670_v0 = vmov 0.0   ;;  %vm671_vm0 = vmmov 0   ;;  %v268_v1 = vld [vmem:[%s841_s2] sm:$0xff]  ;;  %s242_s10 = scalar_select %p241_p12, %s656_s19, 1  ;;  %v672_v2 = vmov 0   ;;  %vm278_vm1 = vcmask 1041408  }
  0x1a   : > { %495 = vmatprep.subr.bf16.mxu0 %v670_v0  ;;  %497 = vmatprep.mubr.msk.bf16.mxu0 %vm671_vm0, %v670_v0  ;;  %s244_s11 = scalar_select %p243_p13, %s652_s18, 1  ;;  %vm274_vm2 = vcmask 31744   ;;  %vm264_vm3 = vcmask 7168  }
  0x1b   : > { %575 = vset.pattern.permute.xlu0 %v672_v2  ;;  %s483_s12 = sshll.u32 %s242_s10, 1 }
  0x1c   : > { %271 = vperm.xlu0 %575, %v268_v1   ;;  %s246_s13 = sadd.s32 %s483_s12, %s244_s11  ;;  %s227_s11 = sand.u32 1, %s644_s16  }
  0x1d   : > { %s484_s14 = sshll.u32 %s246_s13, 1  ;;  %v267_v5 = vld [vmem:[%s849_s1] sm:$0xf]  ;;  %s486_s6 = sshll.u32 %s246_s13, 3 }
  0x1e   : > { %s248_s27 = scalar_lea.vmem %s848_s0, %s484_s14  ;;  %s786_s10 = scalar_lea.vmem %s843_s4, %s486_s6 }
  0x1f   : > { %v266_v3 = vld [vmem:[%s248_s27] sm:$0x3]  ;;  %265 = vst.msk [vmem:[%s786_s10] sm:$0xff] %vm264_vm3, %v670_v0  ;;  %s482_s12 = sshll.u32 %s227_s11, 2  ;;  %s489_s14 = sshll.u32 %s656_s19, 1 }
  0x20   : > { %v280_v4 = vsel %vm278_vm1, %v266_v3, 0  ;;  %s229_s13 = scalar_lea.vmem [#allocation2], %s482_s12  ;;  %s352_s23 = sadd.s32 %s652_s18, %s489_s14 }
  0x21   : > { %496 = vmatpush3.bf16.msra.mxu0 %v280_v4  ;;  %s490_s24 = sshll.u32 %s352_s23, 6  ;;  %s356_s27 = sshll.u32 %s229_s13, 4  ;;  %s357_s27 = int_to_ptr.vmem [resolvable:$true] %s356_s27 }
  0x22   : > { %s354_s6 = scalar_lea.hbm %s842_s3, %s490_s24  ;;  %s332_s8 = scalar_lea.sflag [#allocation3], %s227_s11 }
  0x23   : > { %s576_s9 = scalar_lea.vmem %s357_s27, 64  ;;  %s673_s0 = smov [#allocation2]  }
  0x24   : > { %498 = vmatmul.mubr.msk.bf16.vlgmr.msra.gmra.mxu0 %vm274_vm2, %v267_v5  ;;  %p577_p0 = scmp.ne.s32.totalorder %s357_s27, %s576_s9  ;;  %s580_s1 = sshll.u32 %s673_s0, 4  ;;  %s581_s1 = int_to_ptr.vmem [resolvable:$false] %s580_s1 }
  0x25   : > { %s582_s12 = scalar_lea.vmem %s581_s1, 128  ;;  %p583_p4 = scmp.lt.s32.totalorder %s357_s27, %s581_s1 }
  0x26   : > { %p578_p1 = pnand %p577_p0, %p750_p3  ;;  %p584_p5 = scmp.lt.s32.totalorder %s582_s12, %s576_s9 }
  0x28   : > { %p579_p2 = pneg %p578_p1  ;;  %p585_p6 = por %p584_p5, %p583_p4 }
  0x2a   : > { %p586_p7 = pnand %p585_p6, %p579_p2 }
  0x97   : > { %v272_v6 = vpop.permute.xlu0 %271 }
  0xe4   : > { %v316_v7 = vpop.f32.mrf.mxu0 }
  0xe5   : > { %v317_v8 = vadd.f32 %v316_v7, %v272_v6 }
  0xe6   : > { %v499_v9 = vpop.f32.mrf.mxu0 }
  0xe7   : > { %v322_v10 = vmax.f32 %v317_v8, 0.0 }
  0xe8   : > { %v319_v11 = vpop.f32.mrf.mxu0 }
  0xe9   : > { %v323_v12 = vpack.c.bf16 %v322_v10, %v322_v10  ;;  %326 = vadd.xlane.f32.xlu0 %v322_v10 }
  0xea   : > { %v500_v13 = vpop.f32.mrf.mxu0 }
  0xeb   : > { %324 = vst [vmem:[%s229_s13] sm:$0xf] %v323_v12 }
  0xec   : > { %589 = shalt.err (!%p586_p7)
}
  0xed   : > { %s590_s18 = scalar_lea.hbm %s354_s6, 64  ;;  %s594_s13 = scalar_lea.hbm %s842_s3, 256 }
  0xee   : > { %p591_p9 = scmp.ne.s32.totalorder %s354_s6, %s590_s18  ;;  %p595_p12 = scmp.lt.s32.totalorder %s354_s6, %s842_s3 }
  0xef   : > { %p596_p13 = scmp.lt.s32.totalorder %s594_s13, %s590_s18 }
  0xf0   : > { %p592_p10 = pnand %p591_p9, %p750_p3 }
  0xf1   : > { %p597_p0 = por %p596_p13, %p595_p12 }
  0xf2   : > { %p593_p11 = pneg %p592_p10 }
  0xf4   : > { %p598_p1 = pnand %p597_p0, %p593_p11 }
  0xf6   : > { %601 = shalt.err (!%p598_p1)
}
  0xf7   : > { %501 = dma.vmem_to_hbm [thread:$0]  (%p750_p3), %s357_s27, 64, %s354_s6, %s332_s8   ;;  %v325_v14 = vld [vmem:[%s786_s10] sm:$0xff] }
 0x172   : > { %v327_v15 = vpop.xlane.xlu0 %326 }
 0x173   : > { %v328_v16 = vadd.f32 %v327_v15, %v325_v14 }
 0x175   : > { %330 = vst.msk [vmem:[%s786_s10] sm:$0xff] %vm264_vm3, %v328_v16 }
 0x176 PF: > { %p507_p2 = scmp.ge.s32.totalorder %s668_s22, 2  ;;  %s371_s0 = sand.u32 1, %s640_s15  }
 0x177   : > { %s372_s1 = scalar_lea.sflag [#allocation3], %s371_s0 }
 0x178   : > { %p504_p4 = pnand %p507_p2, %p759_p8 }
 0x17a   : > { %p505_p5 = pneg %p504_p4 }
 0x17c   : > { %635 = dma.done.wait (%p505_p5), %s372_s1, 64  }
 0x17d   : > { %637 = vsyncadd (%p505_p5), %s372_s1, 4294967232  ;;  %s18_s22 = sadd.s32 1, %s668_s22   ;;  %s850_s15 = smov %s644_s16 }
 0x17e   : > { %p15_p3 = scmp.ge.s32.totalorder %s18_s22, 6   ;;  %s851_s16 = smov %s648_s17 }
 0x17f   : > { %s852_s17 = smov %s768_s7  ;;  %s853_s18 = smov %s660_s20 }
 0x180   : > { %s854_s19 = smov %s664_s21  ;;  %s855_s20 = smov %s858_s25 }
 0x181   : > { %s856_s21 = smov %s862_s26  ;;  %17 = sbr.rel (!%p15_p3) target bundleno = 8 (0x8), region = 83 }
 0x186   :  { %388 = vsyncpa [#allocation3], 1 }
 0x187   :  { %390 = vsyncpa [#allocation3 + $0x1], 1 }

</bundles_post_ra>
